<compile_context>
chip_gen: v5e
topology: v5e:2x2
jax: 0.10.0
libtpu: 0.0.40
codegen_flags: <defaults>
</compile_context>

<pallas_src>
import jax
import jax.numpy as jnp
from jax.experimental import pallas as pl
from jax.experimental.pallas import tpu as pltpu  # noqa: F401  (TPU backend assumed)

# ----------------------- config (matches the PyTorch module) -----------------------
IMAGE_SIZE = 32
PATCH_SIZE = 4
IN_CHANNELS = 3
EMBED_DIM = 256
BATCH = 2

NUM_PATCHES = (IMAGE_SIZE // PATCH_SIZE) ** 2          # 64
PATCH_FLAT = IN_CHANNELS * PATCH_SIZE * PATCH_SIZE     # 48
LN_EPS = 1e-5                                          # nn.LayerNorm default


# ----------------------------------- kernel ----------------------------------------
def patch_embed_kernel(p_ref, w_ref, b_ref, g_ref, beta_ref, o_ref):
    # p_ref: (B*Np, PATCH_FLAT) bf16   w_ref: (PATCH_FLAT, D) bf16
    # b_ref/g_ref/beta_ref: (1, D) f32  o_ref: (B*Np, D) f32
    y = jnp.dot(p_ref[...], w_ref[...], preferred_element_type=jnp.float32)
    y = y + b_ref[...]                                   # conv bias
    mu = jnp.mean(y, axis=-1, keepdims=True)             # LayerNorm (f32)
    var = jnp.mean((y - mu) ** 2, axis=-1, keepdims=True)
    o_ref[...] = (y - mu) * jax.lax.rsqrt(var + LN_EPS) * g_ref[...] + beta_ref[...]


# ---------------------------------- wrapper -----------------------------------------
def patch_embedding(x, conv_w, conv_b, ln_g, ln_b):
    """x: (B, C, H, W) f32.  Returns (B, num_patches, embed_dim) f32."""
    B = x.shape[0]
    hp = IMAGE_SIZE // PATCH_SIZE

    # NCHW -> (B*Np, C*ps*ps), flattening each patch in (c, kh, kw) order, which is
    # exactly the order of a flattened Conv2d(k=s=patch) weight -> conv becomes a matmul.
    p = x.reshape(B, IN_CHANNELS, hp, PATCH_SIZE, hp, PATCH_SIZE)
    p = p.transpose(0, 2, 4, 1, 3, 5).reshape(B * NUM_PATCHES, PATCH_FLAT)

    # Conv2d weight (D, C, ps, ps) -> (C*ps*ps, D)
    w = conv_w.reshape(EMBED_DIM, PATCH_FLAT).T

    out = pl.pallas_call(
        patch_embed_kernel,
        out_shape=jax.ShapeDtypeStruct((B * NUM_PATCHES, EMBED_DIM), jnp.float32),
        # No grid: whole arrays land in VMEM (~200 KB total), single fused step.
    )(
        p.astype(jnp.bfloat16),
        w.astype(jnp.bfloat16),
        conv_b.reshape(1, EMBED_DIM).astype(jnp.float32),
        ln_g.reshape(1, EMBED_DIM).astype(jnp.float32),
        ln_b.reshape(1, EMBED_DIM).astype(jnp.float32),
    )
    return out.reshape(B, NUM_PATCHES, EMBED_DIM)


# ------------------------------ pure-JAX reference ----------------------------------
def patch_embedding_ref(x, conv_w, conv_b, ln_g, ln_b):
    B = x.shape[0]
    hp = IMAGE_SIZE // PATCH_SIZE
    p = x.reshape(B, IN_CHANNELS, hp, PATCH_SIZE, hp, PATCH_SIZE)
    p = p.transpose(0, 2, 4, 1, 3, 5).reshape(B, NUM_PATCHES, PATCH_FLAT)
    w = conv_w.reshape(EMBED_DIM, PATCH_FLAT).T
    y = jnp.einsum("bpf,fd->bpd", p, w) + conv_b
    mu = jnp.mean(y, axis=-1, keepdims=True)
    var = jnp.mean((y - mu) ** 2, axis=-1, keepdims=True)
    return (y - mu) * jax.lax.rsqrt(var + LN_EPS) * ln_g + ln_b


# ------------------------------------- main ------------------------------------------
if __name__ == "__main__":
    key = jax.random.PRNGKey(0)
    kx, kw, kb = jax.random.split(key, 3)

    x = jax.random.normal(kx, (BATCH, IN_CHANNELS, IMAGE_SIZE, IMAGE_SIZE), jnp.float32)

    # PyTorch-style Conv2d init (uniform +-1/sqrt(fan_in)), LayerNorm gamma=1 beta=0.
    bound = 1.0 / (PATCH_FLAT ** 0.5)
    conv_w = jax.random.uniform(kw, (EMBED_DIM, IN_CHANNELS, PATCH_SIZE, PATCH_SIZE),
                                jnp.float32, -bound, bound)
    conv_b = jax.random.uniform(kb, (EMBED_DIM,), jnp.float32, -bound, bound)
    ln_g = jnp.ones((EMBED_DIM,), jnp.float32)
    ln_b = jnp.zeros((EMBED_DIM,), jnp.float32)

    out = jax.jit(patch_embedding)(x, conv_w, conv_b, ln_g, ln_b)
    out = jax.block_until_ready(out)

    assert out.shape == (BATCH, NUM_PATCHES, EMBED_DIM)
    assert bool(jnp.all(jnp.isfinite(out)))

    # bf16 matmul operands -> allow small deviation from the f32 reference.
    ref = patch_embedding_ref(x, conv_w, conv_b, ln_g, ln_b)
    max_err = float(jnp.max(jnp.abs(out - ref)))
    assert max_err < 5e-2, f"max abs err vs f32 reference: {max_err}"

    print("KERNEL_OK")
</pallas_src>

<mosaic_0001>
module attributes {stable_mosaic.version = 11 : i64} {
  func.func @patch_embed_kernel(%arg0: memref<128x48xbf16, #tpu.memory_space<vmem>>, %arg1: memref<48x256xbf16, #tpu.memory_space<vmem>>, %arg2: memref<1x256xf32, #tpu.memory_space<vmem>>, %arg3: memref<1x256xf32, #tpu.memory_space<vmem>>, %arg4: memref<1x256xf32, #tpu.memory_space<vmem>>, %arg5: memref<128x256xf32, #tpu.memory_space<vmem>>) attributes {dimension_semantics = [], scalar_prefetch = 0 : i64, scratch_operands = 0 : i64, tpu.core_type = #tpu.core_type<tc>} {
    %c0 = arith.constant 0 : index
    %c0_0 = arith.constant 0 : index
    %0 = vector.load %arg0[%c0, %c0_0] : memref<128x48xbf16, #tpu.memory_space<vmem>>, vector<128x48xbf16>
    %c0_1 = arith.constant 0 : index
    %c0_2 = arith.constant 0 : index
    %1 = vector.load %arg1[%c0_1, %c0_2] : memref<48x256xbf16, #tpu.memory_space<vmem>>, vector<48x256xbf16>
    %cst = arith.constant dense<0.000000e+00> : vector<128x256xf32>
    %2 = tpu.matmul %0, %1, %cst {dimension_numbers = #tpu.dot_dimension_numbers<[1], [0], [0], [1], [0, 0, 1, 1], [], []>} : vector<128x48xbf16>, vector<48x256xbf16>, vector<128x256xf32> -> vector<128x256xf32>
    %c0_3 = arith.constant 0 : index
    %c0_4 = arith.constant 0 : index
    %3 = vector.load %arg2[%c0_3, %c0_4] : memref<1x256xf32, #tpu.memory_space<vmem>>, vector<1x256xf32>
    %4 = vector.broadcast %3 : vector<1x256xf32> to vector<128x256xf32>
    %5 = arith.addf %2, %4 : vector<128x256xf32>
    %cst_5 = arith.constant dense<0.000000e+00> : vector<128xf32>
    %6 = vector.multi_reduction <add>, %5, %cst_5 [1] : vector<128x256xf32> to vector<128xf32>
    %7 = vector.shape_cast %6 : vector<128xf32> to vector<128x1xf32>
    %cst_6 = arith.constant 2.560000e+02 : f32
    %8 = vector.broadcast %cst_6 : f32 to vector<128x1xf32>
    %9 = arith.divf %7, %8 : vector<128x1xf32>
    %10 = vector.broadcast %9 : vector<128x1xf32> to vector<128x256xf32>
    %11 = arith.subf %5, %10 : vector<128x256xf32>
    %12 = arith.mulf %11, %11 : vector<128x256xf32>
    %cst_7 = arith.constant dense<0.000000e+00> : vector<128xf32>
    %13 = vector.multi_reduction <add>, %12, %cst_7 [1] : vector<128x256xf32> to vector<128xf32>
    %14 = vector.shape_cast %13 : vector<128xf32> to vector<128x1xf32>
    %cst_8 = arith.constant 2.560000e+02 : f32
    %15 = vector.broadcast %cst_8 : f32 to vector<128x1xf32>
    %16 = arith.divf %14, %15 : vector<128x1xf32>
    %17 = vector.broadcast %9 : vector<128x1xf32> to vector<128x256xf32>
    %18 = arith.subf %5, %17 : vector<128x256xf32>
    %cst_9 = arith.constant 9.99999974E-6 : f32
    %19 = vector.broadcast %cst_9 : f32 to vector<128x1xf32>
    %20 = arith.addf %16, %19 : vector<128x1xf32>
    %21 = math.rsqrt %20 : vector<128x1xf32>
    %22 = vector.broadcast %21 : vector<128x1xf32> to vector<128x256xf32>
    %23 = arith.mulf %18, %22 : vector<128x256xf32>
    %c0_10 = arith.constant 0 : index
    %c0_11 = arith.constant 0 : index
    %24 = vector.load %arg3[%c0_10, %c0_11] : memref<1x256xf32, #tpu.memory_space<vmem>>, vector<1x256xf32>
    %25 = vector.broadcast %24 : vector<1x256xf32> to vector<128x256xf32>
    %26 = arith.mulf %23, %25 : vector<128x256xf32>
    %c0_12 = arith.constant 0 : index
    %c0_13 = arith.constant 0 : index
    %27 = vector.load %arg4[%c0_12, %c0_13] : memref<1x256xf32, #tpu.memory_space<vmem>>, vector<1x256xf32>
    %28 = vector.broadcast %27 : vector<1x256xf32> to vector<128x256xf32>
    %29 = arith.addf %26, %28 : vector<128x256xf32>
    %c0_14 = arith.constant 0 : index
    %c0_15 = arith.constant 0 : index
    %30 = vector.load %arg5[%c0_14, %c0_15] : memref<128x256xf32, #tpu.memory_space<vmem>>, vector<128x256xf32>
    tpu.vector_store %arg5[%c0_14, %c0_15], %29 {strides = array<i32>} : memref<128x256xf32, #tpu.memory_space<vmem>>, vector<128x256xf32>,
    return
  }
}

</mosaic_0001>

<bundles_post_ra>
// kernel: patch_embedding.1
= control target key start
LH: loop header
LB: loop body
LE: loop exit
PB: predicated region body
PF: predicated region fallthrough
CT: control target
= control target key end

     0   :  { %s1572_s0 = inlined_call_operand.vmem [shape: bf16[128,48], index: 0, kind: input, shape index: {}]   ;;  %s1573_s1 = inlined_call_operand.vmem [shape: bf16[48,256], index: 1, kind: input, shape index: {}]   ;;  %s1574_s2 = inlined_call_operand.vmem [shape: f32[1,256], index: 2, kind: input, shape index: {}]   ;;  %s1575_s3 = inlined_call_operand.vmem [shape: f32[1,256], index: 3, kind: input, shape index: {}]   ;;  %s1576_s4 = inlined_call_operand.vmem [shape: f32[1,256], index: 4, kind: input, shape index: {}]   ;;  %s1577_s5 = inlined_call_operand.hbm [shape: f32[128,256], index: 5, kind: output, shape index: {}]  }
   0x1   :  { %v826_v0 = vld [vmem:[%s1573_s1 + $0x20] sm:$0xf]  ;;  %v861_v1 = vld [vmem:[%s1573_s1 + $0x24] sm:$0xf0]  ;;  %v860_v2 = vld [vmem:[%s1573_s1 + $0x24] sm:$0xf] }
   0x2   :  { %v827_v3 = vor.u32 %v861_v1, %v826_v0  ;;  %v828_v4 = vld [vmem:[%s1573_s1 + $0x28] sm:$0xf0]  ;;  %v818_v5 = vld [vmem:[%s1573_s1 + $0x10] sm:$0xf]  ;;  %v859_v6 = vld [vmem:[%s1573_s1 + $0x14] sm:$0xf0] }
   0x3   :  { %v831_v7 = vor.u32 %v860_v2, %v828_v4  ;;  %v858_v8 = vld [vmem:[%s1573_s1 + $0x14] sm:$0xf]  ;;  %v820_v9 = vld [vmem:[%s1573_s1 + $0x18] sm:$0xf0]  ;;  %v819_v10 = vor.u32 %v859_v6, %v818_v5  ;;  %v810_v12 = vld [vmem:[%s1573_s1] sm:$0xf] }
   0x4   :  { %150 = vmatpush.bf16.msra.mxu0 %v827_v3  ;;  %862 = vmatpush.bf16.msra.mxu2 %v827_v3  ;;  %v823_v11 = vor.u32 %v858_v8, %v820_v9  ;;  %v857_v13 = vld [vmem:[%s1573_s1 + $0x4] sm:$0xf0]  ;;  %v856_v14 = vld [vmem:[%s1573_s1 + $0x4] sm:$0xf]  ;;  %v812_v15 = vld [vmem:[%s1573_s1 + $0x8] sm:$0xf0] }
   0x5   :  { %199 = vmatpush.bf16.msra.mxu1 %v831_v7  ;;  %865 = vmatpush.bf16.msra.mxu3 %v831_v7 }
   0x6   :  { %10 = vsyncpa [#allocation3], 0  ;;  %v811_v16 = vor.u32 %v857_v13, %v810_v12  ;;  %v815_v17 = vor.u32 %v856_v14, %v812_v15  ;;  %v848_v18 = vld [vmem:[%s1572_s0] sm:$0xff]  ;;  %vm120_vm0 = vcmask 392192   ;;  %v849_v20 = vld [vmem:[%s1572_s0 + $0x8] sm:$0xff]  ;;  %s764_s13 = sshll.u32 %s1577_s5, 4  ;;  %s765_s13 = int_to_ptr.hbm [resolvable:$true] %s764_s13 }
   0x7   :  { %v852_v19 = vld [vmem:[%s1572_s0 + $0x20] sm:$0xff]  ;;  %v853_v21 = vld [vmem:[%s1572_s0 + $0x28] sm:$0xff]  ;;  %v850_v22 = vld [vmem:[%s1572_s0 + $0x10] sm:$0xff]  ;;  %s934_s14 = smov 256   ;;  %s935_s15 = smov 16  }
   0x8   :  { %151 = vmatpush.bf16.msra.mxu0 %v819_v10  ;;  %863 = vmatpush.bf16.msra.mxu2 %v819_v10  ;;  %v854_v23 = vld [vmem:[%s1572_s0 + $0x30] sm:$0xff]  ;;  %v851_v24 = vld [vmem:[%s1572_s0 + $0x18] sm:$0xff]  ;;  %v44_v26 = vld [vmem:[%s1574_s2] sm:$0x3] }
   0x9   :  { %200 = vmatpush.bf16.msra.mxu1 %v823_v11  ;;  %866 = vmatpush.bf16.msra.mxu3 %v823_v11  ;;  %v855_v25 = vld [vmem:[%s1572_s0 + $0x38] sm:$0xff]  ;;  %v1045_v27 = vperm.slane %v44_v26, 0  ;;  %v1047_v28 = vperm.slane %v44_v26, 1 }
   0xc   :  { %152 = vmatpush.bf16.msra.mxu0 %v811_v16  ;;  %864 = vmatpush.bf16.msra.mxu2 %v811_v16 }
   0xd   :  { %201 = vmatpush.bf16.msra.mxu1 %v815_v17  ;;  %867 = vmatpush.bf16.msra.mxu3 %v815_v17 }
   0xf   :  { %832 = vmatmul.msk.bf16.vlgmr.msra.gmra.mxu0 %vm120_vm0, %v848_v18  ;;  %836 = vmatmul.msk.bf16.vlgmr.msra.gmra.mxu2 %vm120_vm0, %v852_v19 }
  0x10   :  { %840 = vmatmul.msk.bf16.vlgmr.msra.gmra.mxu1 %vm120_vm0, %v848_v18  ;;  %844 = vmatmul.msk.bf16.vlgmr.msra.gmra.mxu3 %vm120_vm0, %v852_v19 }
  0x1f   :  { %833 = vmatmul.msk.bf16.gmra.mxu0 %vm120_vm0, %v849_v20  ;;  %837 = vmatmul.msk.bf16.gmra.mxu2 %vm120_vm0, %v853_v21 }
  0x20   :  { %841 = vmatmul.msk.bf16.gmra.mxu1 %vm120_vm0, %v849_v20  ;;  %845 = vmatmul.msk.bf16.gmra.mxu3 %vm120_vm0, %v853_v21 }
  0x2f   :  { %834 = vmatmul.msk.bf16.gmra.mxu0 %vm120_vm0, %v850_v22  ;;  %838 = vmatmul.msk.bf16.gmra.mxu2 %vm120_vm0, %v854_v23 }
  0x30   :  { %842 = vmatmul.msk.bf16.gmra.mxu1 %vm120_vm0, %v850_v22  ;;  %846 = vmatmul.msk.bf16.gmra.mxu3 %vm120_vm0, %v854_v23 }
  0x3f   :  { %835 = vmatmul.msk.bf16.gmra.mxu0 %vm120_vm0, %v851_v24  ;;  %839 = vmatmul.msk.bf16.gmra.mxu2 %vm120_vm0, %v855_v25 }
  0x40   :  { %843 = vmatmul.msk.bf16.gmra.mxu1 %vm120_vm0, %v851_v24  ;;  %847 = vmatmul.msk.bf16.gmra.mxu3 %vm120_vm0, %v855_v25 }
  0x8c   :  { %v154_v29 = vpop.f32.mrf.mxu0 }
  0x8d   :  { %v1050_v30 = vadd.f32 %v154_v29, %v1045_v27  ;;  %v203_v31 = vpop.f32.mrf.mxu1 }
  0x8e   :  { %v1053_v32 = vadd.f32 %v203_v31, %v1047_v28 }
  0x90   :  { %v243_v33 = vadd.f32 %v1053_v32, %v1050_v30 }
  0x92   :  { %244 = vadd.xlane.f32.xlu0 %v243_v33  ;;  %v174_v34 = vpop.f32.mrf.mxu2 }
  0x93   :  { %v1058_v35 = vadd.f32 %v174_v34, %v1045_v27  ;;  %v223_v36 = vpop.f32.mrf.mxu3 }
  0x94   :  { %v1061_v37 = vadd.f32 %v223_v36, %v1047_v28  ;;  %v156_v38 = vpop.f32.mrf.mxu0 }
  0x95   :  { %v1064_v39 = vadd.f32 %v156_v38, %v1045_v27  ;;  %v205_v40 = vpop.f32.mrf.mxu1 }
  0x96   :  { %v1067_v41 = vadd.f32 %v205_v40, %v1047_v28  ;;  %v267_v42 = vadd.f32 %v1061_v37, %v1058_v35 }
  0x98   :  { %268 = vadd.xlane.f32.xlu2 %v267_v42  ;;  %v246_v43 = vadd.f32 %v1067_v41, %v1064_v39 }
  0x9a   :  { %247 = vadd.xlane.f32.xlu0 %v246_v43  ;;  %v176_v44 = vpop.f32.mrf.mxu2 }
  0x9b   :  { %v225_v45 = vpop.f32.mrf.mxu3  ;;  %v1074_v46 = vadd.f32 %v176_v44, %v1045_v27 }
  0x9c   :  { %v1077_v47 = vadd.f32 %v225_v45, %v1047_v28  ;;  %v159_v48 = vpop.f32.mrf.mxu0 }
  0x9d   :  { %v1080_v49 = vadd.f32 %v159_v48, %v1045_v27  ;;  %v208_v50 = vpop.f32.mrf.mxu1 }
  0x9e   :  { %v1083_v51 = vadd.f32 %v208_v50, %v1047_v28  ;;  %v270_v53 = vadd.f32 %v1077_v47, %v1074_v46 }
  0xa0   :  { %v249_v52 = vadd.f32 %v1083_v51, %v1080_v49 }
  0xa2   :  { %250 = vadd.xlane.f32.xlu1 %v249_v52  ;;  %271 = vadd.xlane.f32.xlu0 %v270_v53  ;;  %v179_v54 = vpop.f32.mrf.mxu2 }
  0xa3   :  { %v1090_v55 = vadd.f32 %v179_v54, %v1045_v27  ;;  %v228_v56 = vpop.f32.mrf.mxu3 }
  0xa4   :  { %v1093_v57 = vadd.f32 %v228_v56, %v1047_v28  ;;  %v161_v58 = vpop.f32.mrf.mxu0 }
  0xa5   :  { %v210_v59 = vpop.f32.mrf.mxu1  ;;  %v1101_v0 = vadd.f32 %v161_v58, %v1045_v27 }
  0xa6   :  { %v273_v60 = vadd.f32 %v1093_v57, %v1090_v55  ;;  %v1104_v1 = vadd.f32 %v210_v59, %v1047_v28  ;;  %v932_v59 = vmov 256.0  }
  0xa7   :  { %872 = vrcp.f32 %v932_v59 }
  0xa8   :  { %v252_v6 = vadd.f32 %v1104_v1, %v1101_v0 }
  0xaa   :  { %274 = vadd.xlane.f32.xlu1 %v273_v60  ;;  %v181_v61 = vpop.f32.mrf.mxu2 }
  0xab   :  { %v1098_v62 = vadd.f32 %v181_v61, %v1045_v27  ;;  %v230_v63 = vpop.f32.mrf.mxu3 }
  0xac   :  { %v1107_v2 = vadd.f32 %v230_v63, %v1047_v28  ;;  %v164_v3 = vpop.f32.mrf.mxu0 }
  0xad   :  { %v213_v4 = vpop.f32.mrf.mxu1  ;;  %v1114_v7 = vadd.f32 %v164_v3, %v1045_v27  ;;  %v873_v60 = vpop.eup %872 }
  0xae   :  { %v276_v5 = vadd.f32 %v1107_v2, %v1098_v62  ;;  %v1117_v8 = vadd.f32 %v213_v4, %v1047_v28  ;;  %v292_v61 = vmul.f32 256.0, %v873_v60  ;;  %vm296_vm1 = vweird.f32 %v873_v60 }
  0xb0   :  { %277 = vadd.xlane.f32.xlu2 %v276_v5  ;;  %v255_v15 = vadd.f32 %v1117_v8, %v1114_v7  ;;  %v293_v63 = vsub.f32 1.0, %v292_v61 }
  0xb2   :  { %253 = vadd.xlane.f32.xlu1 %v252_v6  ;;  %v184_v9 = vpop.f32.mrf.mxu2  ;;  %v294_v3 = vmul.f32 %v873_v60, %v293_v63 }
  0xb3   :  { %v1120_v10 = vadd.f32 %v184_v9, %v1045_v27  ;;  %v233_v11 = vpop.f32.mrf.mxu3 }
  0xb4   :  { %v1123_v12 = vadd.f32 %v233_v11, %v1047_v28  ;;  %v166_v13 = vpop.f32.mrf.mxu0  ;;  %v295_v4 = vadd.f32 %v873_v60, %v294_v3 }
  0xb5   :  { %v215_v14 = vpop.f32.mrf.mxu1  ;;  %v1130_v17 = vadd.f32 %v166_v13, %v1045_v27 }
  0xb6   :  { %v279_v16 = vadd.f32 %v1123_v12, %v1120_v10  ;;  %v1133_v18 = vadd.f32 %v215_v14, %v1047_v28  ;;  %v1177_v5 = vsel %vm296_vm1, %v873_v60, %v295_v4 }
  0xb8   :  { %256 = vadd.xlane.f32.xlu2 %v255_v15  ;;  %280 = vadd.xlane.f32.xlu0 %v279_v16  ;;  %v258_v29 = vadd.f32 %v1133_v18, %v1130_v17 }
  0xba   :  { %v186_v19 = vpop.f32.mrf.mxu2 }
  0xbb   :  { %v1136_v20 = vadd.f32 %v186_v19, %v1045_v27  ;;  %v235_v21 = vpop.f32.mrf.mxu3 }
  0xbc   :  { %v1139_v22 = vadd.f32 %v235_v21, %v1047_v28  ;;  %v169_v23 = vpop.f32.mrf.mxu0 }
  0xbd   :  { %v1142_v24 = vadd.f32 %v169_v23, %v1045_v27  ;;  %v218_v25 = vpop.f32.mrf.mxu1 }
  0xbe   :  { %v1145_v26 = vadd.f32 %v218_v25, %v1047_v28  ;;  %v282_v31 = vadd.f32 %v1139_v22, %v1136_v20 }
  0xc0   :  { %259 = vadd.xlane.f32.xlu2 %v258_v29  ;;  %283 = vadd.xlane.f32.xlu1 %v282_v31  ;;  %v261_v33 = vadd.f32 %v1145_v26, %v1142_v24 }
  0xc2   :  { %262 = vadd.xlane.f32.xlu0 %v261_v33  ;;  %v189_v34 = vpop.f32.mrf.mxu2 }
  0xc3   :  { %v1154_v36 = vadd.f32 %v189_v34, %v1045_v27  ;;  %v238_v38 = vpop.f32.mrf.mxu3 }
  0xc4   :  { %v1157_v40 = vadd.f32 %v238_v38, %v1047_v28  ;;  %v171_v42 = vpop.f32.mrf.mxu0 }
  0xc5   :  { %v1160_v43 = vadd.f32 %v171_v42, %v1045_v27  ;;  %v220_v44 = vpop.f32.mrf.mxu1 }
  0xc6   :  { %v1163_v45 = vadd.f32 %v220_v44, %v1047_v28  ;;  %v285_v48 = vadd.f32 %v1157_v40, %v1154_v36 }
  0xc8   :  { %286 = vadd.xlane.f32.xlu2 %v285_v48  ;;  %v264_v50 = vadd.f32 %v1163_v45, %v1160_v43 }
  0xca   :  { %265 = vadd.xlane.f32.xlu1 %v264_v50  ;;  %v191_v52 = vpop.f32.mrf.mxu2 }
  0xcb   :  { %v1170_v53 = vadd.f32 %v191_v52, %v1045_v27  ;;  %v240_v54 = vpop.f32.mrf.mxu3 }
  0xcc   :  { %v1173_v56 = vadd.f32 %v240_v54, %v1047_v28 }
  0xce   :  { %v288_v58 = vadd.f32 %v1173_v56, %v1170_v53 }
  0xd0   :  { %289 = vadd.xlane.f32.xlu0 %v288_v58 }
 0x105   :  { %v245_v27 = vpop.xlane.xlu0 %244 }
 0x106   :  { %v298_v6 = vmul.f32 %v1177_v5, %v245_v27 }
 0x108   :  { %v1181_v28 = vsub.f32 %v1050_v30, %v298_v6  ;;  %v1184_v9 = vsub.f32 %v1053_v32, %v298_v6 }
 0x10a   :  { %v346_v11 = vmul.f32 %v1181_v28, %v1181_v28  ;;  %v347_v13 = vmul.f32 %v1184_v9, %v1184_v9 }
 0x10b   :  { %v269_v14 = vpop.xlane.xlu2 %268 }
 0x10c   :  { %v306_v15 = vmul.f32 %v1177_v5, %v269_v14  ;;  %v378_v16 = vadd.f32 %v347_v13, %v346_v11 }
 0x10d   :  { %v248_v19 = vpop.xlane.xlu0 %247 }
 0x10e   :  { %v1192_v21 = vsub.f32 %v1058_v35, %v306_v15  ;;  %v1195_v30 = vsub.f32 %v1061_v37, %v306_v15  ;;  %v299_v32 = vmul.f32 %v1177_v5, %v248_v19  ;;  %379 = vadd.xlane.f32.xlu1 %v378_v16 }
 0x110   :  { %v1199_v23 = vsub.f32 %v1064_v39, %v299_v32  ;;  %v1202_v25 = vsub.f32 %v1067_v41, %v299_v32  ;;  %v362_v29 = vmul.f32 %v1192_v21, %v1192_v21  ;;  %v363_v31 = vmul.f32 %v1195_v30, %v1195_v30 }
 0x112   :  { %v402_v35 = vadd.f32 %v363_v31, %v362_v29  ;;  %v348_v37 = vmul.f32 %v1199_v23, %v1199_v23  ;;  %v349_v33 = vmul.f32 %v1202_v25, %v1202_v25 }
 0x114   :  { %403 = vadd.xlane.f32.xlu0 %v402_v35  ;;  %v381_v34 = vadd.f32 %v349_v33, %v348_v37 }
 0x115   :  { %v251_v39 = vpop.xlane.xlu1 %250  ;;  %v272_v38 = vpop.xlane.xlu0 %271 }
 0x116   :  { %v300_v41 = vmul.f32 %v1177_v5, %v251_v39  ;;  %v307_v42 = vmul.f32 %v1177_v5, %v272_v38  ;;  %382 = vadd.xlane.f32.xlu2 %v381_v34 }
 0x118   :  { %v1215_v44 = vsub.f32 %v1080_v49, %v300_v41  ;;  %v1218_v48 = vsub.f32 %v1083_v51, %v300_v41  ;;  %v1221_v50 = vsub.f32 %v1074_v46, %v307_v42  ;;  %v1224_v52 = vsub.f32 %v1077_v47, %v307_v42 }
 0x11a   :  { %v350_v54 = vmul.f32 %v1215_v44, %v1215_v44  ;;  %v351_v58 = vmul.f32 %v1218_v48, %v1218_v48  ;;  %v364_v59 = vmul.f32 %v1221_v50, %v1221_v50  ;;  %v365_v49 = vmul.f32 %v1224_v52, %v1224_v52 }
 0x11c   :  { %v384_v51 = vadd.f32 %v351_v58, %v350_v54  ;;  %v405_v60 = vadd.f32 %v365_v49, %v364_v59 }
 0x11d   :  { %v275_v61 = vpop.xlane.xlu1 %274 }
 0x11e   :  { %v308_v46 = vmul.f32 %v1177_v5, %v275_v61  ;;  %385 = vadd.xlane.f32.xlu0 %v384_v51  ;;  %406 = vadd.xlane.f32.xlu1 %v405_v60 }
 0x120   :  { %v1236_v47 = vsub.f32 %v1090_v55, %v308_v46  ;;  %v1239_v63 = vsub.f32 %v1093_v57, %v308_v46 }
 0x122   :  { %v366_v3 = vmul.f32 %v1236_v47, %v1236_v47  ;;  %v367_v4 = vmul.f32 %v1239_v63, %v1239_v63 }
 0x123   :  { %v278_v27 = vpop.xlane.xlu2 %277 }
 0x124   :  { %v309_v6 = vmul.f32 %v1177_v5, %v278_v27  ;;  %v408_v11 = vadd.f32 %v367_v4, %v366_v3 }
 0x125   :  { %v254_v13 = vpop.xlane.xlu1 %253 }
 0x126   :  { %v1247_v14 = vsub.f32 %v1098_v62, %v309_v6  ;;  %v1250_v55 = vsub.f32 %v1107_v2, %v309_v6  ;;  %v301_v57 = vmul.f32 %v1177_v5, %v254_v13  ;;  %409 = vadd.xlane.f32.xlu2 %v408_v11 }
 0x128   :  { %v1254_v15 = vsub.f32 %v1101_v0, %v301_v57  ;;  %v1257_v16 = vsub.f32 %v1104_v1, %v301_v57  ;;  %v368_v19 = vmul.f32 %v1247_v14, %v1247_v14  ;;  %v369_v32 = vmul.f32 %v1250_v55, %v1250_v55 }
 0x12a   :  { %v411_v62 = vadd.f32 %v369_v32, %v368_v19  ;;  %v352_v2 = vmul.f32 %v1254_v15, %v1254_v15  ;;  %v353_v29 = vmul.f32 %v1257_v16, %v1257_v16 }
 0x12b   :  { %v257_v31 = vpop.xlane.xlu2 %256  ;;  %v281_v35 = vpop.xlane.xlu0 %280 }
 0x12c   :  { %v302_v0 = vmul.f32 %v1177_v5, %v257_v31  ;;  %v310_v1 = vmul.f32 %v1177_v5, %v281_v35  ;;  %412 = vadd.xlane.f32.xlu0 %v411_v62  ;;  %v387_v37 = vadd.f32 %v353_v29, %v352_v2 }
 0x12e   :  { %v1270_v33 = vsub.f32 %v1114_v7, %v302_v0  ;;  %v1273_v34 = vsub.f32 %v1117_v8, %v302_v0  ;;  %v1276_v39 = vsub.f32 %v1120_v10, %v310_v1  ;;  %v1279_v38 = vsub.f32 %v1123_v12, %v310_v1  ;;  %388 = vadd.xlane.f32.xlu1 %v387_v37 }
 0x130   :  { %v354_v41 = vmul.f32 %v1270_v33, %v1270_v33  ;;  %v355_v42 = vmul.f32 %v1273_v34, %v1273_v34  ;;  %v370_v7 = vmul.f32 %v1276_v39, %v1276_v39  ;;  %v371_v8 = vmul.f32 %v1279_v38, %v1279_v38 }
 0x132   :  { %v390_v54 = vadd.f32 %v355_v42, %v354_v41  ;;  %v414_v12 = vadd.f32 %v371_v8, %v370_v7 }
 0x133   :  { %v260_v58 = vpop.xlane.xlu2 %259  ;;  %v284_v59 = vpop.xlane.xlu1 %283 }
 0x134   :  { %v303_v10 = vmul.f32 %v1177_v5, %v260_v58  ;;  %391 = vadd.xlane.f32.xlu2 %v390_v54  ;;  %v311_v62 = vmul.f32 %v1177_v5, %v284_v59 }
 0x135   :  { %v263_v49 = vpop.xlane.xlu0 %262 }
 0x136   :  { %v1291_v51 = vsub.f32 %v1130_v17, %v303_v10  ;;  %v1294_v60 = vsub.f32 %v1133_v18, %v303_v10  ;;  %415 = vadd.xlane.f32.xlu1 %v414_v12  ;;  %v304_v61 = vmul.f32 %v1177_v5, %v263_v49 }
 0x138   :  { %v356_v46 = vmul.f32 %v1291_v51, %v1291_v51  ;;  %v357_v3 = vmul.f32 %v1294_v60, %v1294_v60  ;;  %v1302_v4 = vsub.f32 %v1142_v24, %v304_v61  ;;  %v1305_v27 = vsub.f32 %v1145_v26, %v304_v61 }
 0x13a   :  { %v393_v17 = vadd.f32 %v357_v3, %v356_v46  ;;  %v358_v18 = vmul.f32 %v1302_v4, %v1302_v4  ;;  %v359_v11 = vmul.f32 %v1305_v27, %v1305_v27 }
 0x13b   :  { %v287_v6 = vpop.xlane.xlu2 %286 }
 0x13c   :  { %v312_v13 = vmul.f32 %v1177_v5, %v287_v6  ;;  %394 = vadd.xlane.f32.xlu0 %v393_v17  ;;  %v396_v19 = vadd.f32 %v359_v11, %v358_v18 }
 0x13d   :  { %v266_v57 = vpop.xlane.xlu1 %265 }
 0x13e   :  { %v1313_v32 = vsub.f32 %v1154_v36, %v312_v13  ;;  %v1316_v24 = vsub.f32 %v1157_v40, %v312_v13  ;;  %v305_v26 = vmul.f32 %v1177_v5, %v266_v57  ;;  %397 = vadd.xlane.f32.xlu1 %v396_v19 }
 0x140   :  { %v1321_v2 = vsub.f32 %v1160_v43, %v305_v26  ;;  %v1324_v29 = vsub.f32 %v1163_v45, %v305_v26  ;;  %v374_v31 = vmul.f32 %v1313_v32, %v1313_v32  ;;  %v375_v36 = vmul.f32 %v1316_v24, %v1316_v24 }
 0x141   :  { %v1335_v43 = vsub.f32 %v1136_v20, %v311_v62  ;;  %v1338_v45 = vsub.f32 %v1139_v22, %v311_v62 }
 0x142   :  { %v420_v35 = vadd.f32 %v375_v36, %v374_v31  ;;  %v360_v40 = vmul.f32 %v1321_v2, %v1321_v2  ;;  %v361_v0 = vmul.f32 %v1324_v29, %v1324_v29  ;;  %v650_v36 = vld [vmem:[%s1575_s3] sm:$0x3]  ;;  %s933_s3 = smov [#allocation2]  }
 0x143   :  { %v290_v1 = vpop.xlane.xlu0 %289  ;;  %v372_v22 = vmul.f32 %v1335_v43, %v1335_v43  ;;  %v373_v54 = vmul.f32 %v1338_v45, %v1338_v45 }
 0x144   :  { %v313_v37 = vmul.f32 %v1177_v5, %v290_v1  ;;  %421 = vadd.xlane.f32.xlu0 %v420_v35  ;;  %v399_v41 = vadd.f32 %v361_v0, %v360_v40 }
 0x146   :  { %v1342_v42 = vsub.f32 %v1170_v53, %v313_v37  ;;  %v1345_v7 = vsub.f32 %v1173_v56, %v313_v37  ;;  %400 = vadd.xlane.f32.xlu2 %v399_v41  ;;  %v417_v53 = vadd.f32 %v373_v54, %v372_v22  ;;  %v688_v41 = vld [vmem:[%s1576_s4] sm:$0x3]  ;;  %v1370_v54 = vperm.slane %v650_v36, 0  ;;  %s762_s4 = sshll.u32 %s933_s3, 4  ;;  %s763_s4 = int_to_ptr.vmem [resolvable:$true] %s762_s4 }
 0x148   :  { %v376_v8 = vmul.f32 %v1342_v42, %v1342_v42  ;;  %v377_v20 = vmul.f32 %v1345_v7, %v1345_v7 }
 0x14a   :  { %v423_v58 = vadd.f32 %v377_v20, %v376_v8 }
 0x14c   :  { %424 = vadd.xlane.f32.xlu1 %v423_v58  ;;  %v1372_v58 = vperm.slane %v650_v36, 1 }
 0x14e   :  { %418 = vadd.xlane.f32.xlu2 %v417_v53 }
 0x181   :  { %v380_v10 = vpop.xlane.xlu1 %379 }
 0x182   :  { %v426_v56 = vmul.f32 %v380_v10, %v1177_v5 }
 0x184   :  { %v442_v12 = vadd.f32 1e-05, %v426_v56 }
 0x186   :  { %874 = vrsqrt.f32 %v442_v12  ;;  %vm464_vm3 = vweird.f32 %v442_v12 }
 0x187   :  { %v404_v59 = vpop.xlane.xlu0 %403 }
 0x188   :  { %v434_v49 = vmul.f32 %v404_v59, %v1177_v5  ;;  %v1376_v59 = vperm.slane %v688_v41, 0 }
 0x189   :  { %v383_v61 = vpop.xlane.xlu2 %382 }
 0x18a   :  { %v450_v46 = vadd.f32 1e-05, %v434_v49  ;;  %v427_v3 = vmul.f32 %v383_v61, %v1177_v5  ;;  %v1378_v49 = vperm.slane %v688_v41, 1 }
 0x18c   :  { %v875_v17 = vpop.eup %874  ;;  %876 = vrsqrt.f32 %v450_v46  ;;  %v443_v6 = vadd.f32 1e-05, %v427_v3  ;;  %vm544_vm6 = vweird.f32 %v450_v46 }
 0x18d   :  { %v459_v18 = vmul.f32 %v875_v17, %v442_v12  ;;  %vm465_vm2 = vweird.f32 %v875_v17 }
 0x18e   :  { %878 = vrsqrt.f32 %v443_v6  ;;  %vm466_vm4 = vmor %vm464_vm3, %vm465_vm2  ;;  %vm474_vm9 = vweird.f32 %v443_v6 }
 0x18f   :  { %v460_v11 = vmul.f32 %v875_v17, %v459_v18 }
 0x191   :  { %v461_v13 = vmul.f32 0.5, %v460_v11  ;;  %v407_v57 = vpop.xlane.xlu1 %406  ;;  %v386_v19 = vpop.xlane.xlu0 %385 }
 0x192   :  { %v877_v26 = vpop.eup %876  ;;  %v435_v62 = vmul.f32 %v407_v57, %v1177_v5  ;;  %v428_v31 = vmul.f32 %v386_v19, %v1177_v5 }
 0x193   :  { %v462_v35 = vsub.f32 1.5, %v461_v13  ;;  %v539_v40 = vmul.f32 %v877_v26, %v450_v46  ;;  %vm545_vm5 = vweird.f32 %v877_v26 }
 0x194   :  { %v879_v0 = vpop.eup %878  ;;  %v1363_v1 = vadd.f32 1e-05, %v435_v62  ;;  %v1365_v37 = vadd.f32 1e-05, %v428_v31  ;;  %vm546_vm8 = vmor %vm544_vm6, %vm545_vm5 }
 0x195   :  { %v463_v8 = vmul.f32 %v875_v17, %v462_v35  ;;  %v540_v20 = vmul.f32 %v877_v26, %v539_v40  ;;  %v469_v22 = vmul.f32 %v879_v0, %v443_v6  ;;  %vm475_vm7 = vweird.f32 %v879_v0 }
 0x196   :  { %880 = vrsqrt.f32 %v1363_v1  ;;  %vm476_vm10 = vmor %vm474_vm9, %vm475_vm7  ;;  %vm554_vm12 = vweird.f32 %v1363_v1  ;;  %vm484_vm15 = vweird.f32 %v1365_v37 }
 0x197   :  { %v467_v53 = vsel %vm466_vm4, %v875_v17, %v463_v8  ;;  %v541_v10 = vmul.f32 0.5, %v540_v20  ;;  %v470_v56 = vmul.f32 %v879_v0, %v469_v22  ;;  %882 = vrsqrt.f32 %v1365_v37 }
 0x198   :  { %v618_v12 = vmul.f32 %v467_v53, %v1181_v28  ;;  %v619_v61 = vmul.f32 %v467_v53, %v1184_v9 }
 0x199   :  { %v542_v3 = vsub.f32 1.5, %v541_v10  ;;  %v471_v18 = vmul.f32 0.5, %v470_v56  ;;  %v410_v11 = vpop.xlane.xlu2 %409 }
 0x19a   :  { %v656_v13 = vmul.f32 %v1370_v54, %v618_v12  ;;  %v657_v17 = vmul.f32 %v1372_v58, %v619_v61  ;;  %v436_v57 = vmul.f32 %v410_v11, %v1177_v5 }
 0x19b   :  { %v543_v19 = vmul.f32 %v877_v26, %v542_v3  ;;  %v472_v62 = vsub.f32 1.5, %v471_v18 }
 0x19c   :  { %v881_v31 = vpop.eup %880  ;;  %v694_v36 = vadd.f32 %v1376_v59, %v656_v13  ;;  %v695_v28 = vadd.f32 %v1378_v49, %v657_v17  ;;  %v1387_v9 = vadd.f32 1e-05, %v436_v57 }
 0x19d   :  { %v883_v35 = vpop.eup %882  ;;  %v547_v40 = vsel %vm546_vm8, %v877_v26, %v543_v19  ;;  %v473_v41 = vmul.f32 %v879_v0, %v472_v62  ;;  %v549_v8 = vmul.f32 %v881_v31, %v1363_v1  ;;  %vm555_vm11 = vweird.f32 %v881_v31 }
 0x19e   :  { %726 = vst [vmem:[#allocation2] sm:$0xff] %v694_v36  ;;  %v634_v20 = vmul.f32 %v547_v40, %v1192_v21  ;;  %v635_v46 = vmul.f32 %v547_v40, %v1195_v30  ;;  %v479_v22 = vmul.f32 %v883_v35, %v1365_v37  ;;  %884 = vrsqrt.f32 %v1387_v9  ;;  %vm556_vm14 = vmor %vm554_vm12, %vm555_vm11 }
 0x19f   :  { %727 = vst [vmem:[#allocation2 + $0x8] sm:$0xff] %v695_v28  ;;  %v477_v53 = vsel %vm476_vm10, %v879_v0, %v473_v41  ;;  %v550_v10 = vmul.f32 %v881_v31, %v549_v8  ;;  %v413_v56 = vpop.xlane.xlu0 %412  ;;  %vm485_vm13 = vweird.f32 %v883_v35  ;;  %vm564_vm2 = vweird.f32 %v1387_v9 }
 0x1a0   :  { %v672_v26 = vmul.f32 %v1370_v54, %v634_v20  ;;  %v673_v6 = vmul.f32 %v1372_v58, %v635_v46  ;;  %v620_v12 = vmul.f32 %v477_v53, %v1199_v23  ;;  %v621_v61 = vmul.f32 %v477_v53, %v1202_v25  ;;  %vm486_vm0 = vmor %vm484_vm15, %vm485_vm13 }
 0x1a1   :  { %v551_v21 = vmul.f32 0.5, %v550_v10  ;;  %v480_v30 = vmul.f32 %v883_v35, %v479_v22  ;;  %v437_v3 = vmul.f32 %v413_v56, %v1177_v5  ;;  %v389_v18 = vpop.xlane.xlu1 %388 }
 0x1a2   :  { %v710_v0 = vadd.f32 %v1376_v59, %v672_v26  ;;  %v711_v11 = vadd.f32 %v1378_v49, %v673_v6  ;;  %v658_v13 = vmul.f32 %v1370_v54, %v620_v12  ;;  %v659_v17 = vmul.f32 %v1372_v58, %v621_v61 }
 0x1a3   :  { %v552_v57 = vsub.f32 1.5, %v551_v21  ;;  %v481_v19 = vmul.f32 0.5, %v480_v30  ;;  %v1403_v62 = vadd.f32 1e-05, %v437_v3  ;;  %v429_v23 = vmul.f32 %v389_v18, %v1177_v5 }
 0x1a4   :  { %742 = vst [vmem:[#allocation2 + $0x80] sm:$0xff] %v710_v0  ;;  %v696_v25 = vadd.f32 %v1376_v59, %v658_v13  ;;  %v697_v36 = vadd.f32 %v1378_v49, %v659_v17  ;;  %v885_v28 = vpop.eup %884 }
 0x1a5   :  { %743 = vst [vmem:[#allocation2 + $0x88] sm:$0xff] %v711_v11  ;;  %v553_v40 = vmul.f32 %v881_v31, %v552_v57  ;;  %v482_v41 = vsub.f32 1.5, %v481_v19  ;;  %886 = vrsqrt.f32 %v1403_v62  ;;  %v559_v8 = vmul.f32 %v885_v28, %v1387_v9 }
 0x1a6   :  { %728 = vst [vmem:[#allocation2 + $0x10] sm:$0xff] %v696_v25  ;;  %v1412_v20 = vadd.f32 1e-05, %v429_v23  ;;  %vm565_vm1 = vweird.f32 %v885_v28  ;;  %vm574_vm4 = vweird.f32 %v1403_v62 }
 0x1a7   :  { %729 = vst [vmem:[#allocation2 + $0x18] sm:$0xff] %v697_v36  ;;  %v557_v46 = vsel %vm556_vm14, %v881_v31, %v553_v40  ;;  %v483_v22 = vmul.f32 %v883_v35, %v482_v41  ;;  %v392_v1 = vpop.xlane.xlu2 %391  ;;  %v560_v56 = vmul.f32 %v885_v28, %v559_v8  ;;  %vm566_vm3 = vmor %vm564_vm2, %vm565_vm1 }
 0x1a8   :  { %v636_v53 = vmul.f32 %v557_v46, %v1221_v50  ;;  %v637_v10 = vmul.f32 %v557_v46, %v1224_v52  ;;  %888 = vrsqrt.f32 %v1412_v20  ;;  %v430_v6 = vmul.f32 %v392_v1, %v1177_v5 }
 0x1a9   :  { %v487_v26 = vsel %vm486_vm0, %v883_v35, %v483_v22  ;;  %v416_v12 = vpop.xlane.xlu1 %415  ;;  %v561_v50 = vmul.f32 0.5, %v560_v56  ;;  %vm494_vm6 = vweird.f32 %v1412_v20 }
 0x1aa   :  { %v674_v61 = vmul.f32 %v1370_v54, %v636_v53  ;;  %v675_v31 = vmul.f32 %v1372_v58, %v637_v10  ;;  %v622_v21 = vmul.f32 %v487_v26, %v1215_v44  ;;  %v623_v37 = vmul.f32 %v487_v26, %v1218_v48 }
 0x1ab   :  { %v887_v30 = vpop.eup %886  ;;  %v1423_v3 = vadd.f32 1e-05, %v430_v6  ;;  %v438_v52 = vmul.f32 %v416_v12, %v1177_v5  ;;  %v562_v13 = vsub.f32 1.5, %v561_v50 }
 0x1ac   :  { %v712_v18 = vadd.f32 %v1376_v59, %v674_v61  ;;  %v713_v35 = vadd.f32 %v1378_v49, %v675_v31  ;;  %v660_v0 = vmul.f32 %v1370_v54, %v622_v21  ;;  %v661_v11 = vmul.f32 %v1372_v58, %v623_v37 }
 0x1ad   :  { %v569_v44 = vmul.f32 %v887_v30, %v1403_v62  ;;  %890 = vrsqrt.f32 %v1423_v3  ;;  %v1434_v19 = vadd.f32 1e-05, %v438_v52  ;;  %v563_v23 = vmul.f32 %v885_v28, %v562_v13 }
 0x1ae   :  { %v889_v48 = vpop.eup %888  ;;  %744 = vst [vmem:[#allocation2 + $0x90] sm:$0xff] %v712_v18  ;;  %v698_v17 = vadd.f32 %v1376_v59, %v660_v0  ;;  %v699_v57 = vadd.f32 %v1378_v49, %v661_v11  ;;  %vm575_vm5 = vweird.f32 %v887_v30  ;;  %vm504_vm9 = vweird.f32 %v1423_v3 }
 0x1af   :  { %745 = vst [vmem:[#allocation2 + $0x98] sm:$0xff] %v713_v35  ;;  %v570_v25 = vmul.f32 %v887_v30, %v569_v44  ;;  %v489_v36 = vmul.f32 %v889_v48, %v1412_v20  ;;  %v395_v40 = vpop.xlane.xlu0 %394  ;;  %892 = vrsqrt.f32 %v1434_v19  ;;  %v567_v8 = vsel %vm566_vm3, %v885_v28, %v563_v23  ;;  %vm576_vm8 = vmor %vm574_vm4, %vm575_vm5 }
 0x1b0   :  { %730 = vst [vmem:[#allocation2 + $0x20] sm:$0xff] %v698_v17  ;;  %v431_v41 = vmul.f32 %v395_v40, %v1177_v5  ;;  %v638_v1 = vmul.f32 %v567_v8, %v1236_v47  ;;  %v639_v53 = vmul.f32 %v567_v8, %v1239_v63  ;;  %vm495_vm7 = vweird.f32 %v889_v48 }
 0x1b1   :  { %731 = vst [vmem:[#allocation2 + $0x28] sm:$0xff] %v699_v57  ;;  %v571_v46 = vmul.f32 0.5, %v570_v25  ;;  %v490_v22 = vmul.f32 %v889_v48, %v489_v36  ;;  %v398_v10 = vpop.xlane.xlu1 %397  ;;  %vm496_vm10 = vmor %vm494_vm6, %vm495_vm7  ;;  %vm584_vm14 = vweird.f32 %v1434_v19 }
 0x1b2   :  { %v1444_v9 = vadd.f32 1e-05, %v431_v41  ;;  %v432_v12 = vmul.f32 %v398_v10, %v1177_v5  ;;  %v676_v61 = vmul.f32 %v1370_v54, %v638_v1  ;;  %v677_v28 = vmul.f32 %v1372_v58, %v639_v53 }
 0x1b3   :  { %v891_v56 = vpop.eup %890  ;;  %v572_v26 = vsub.f32 1.5, %v571_v46  ;;  %v491_v6 = vmul.f32 0.5, %v490_v22 }
 0x1b4   :  { %v499_v47 = vmul.f32 %v891_v56, %v1423_v3  ;;  %894 = vrsqrt.f32 %v1444_v9  ;;  %v714_v37 = vadd.f32 %v1376_v59, %v676_v61  ;;  %v715_v50 = vadd.f32 %v1378_v49, %v677_v28 }
 0x1b5   :  { %v573_v63 = vmul.f32 %v887_v30, %v572_v26  ;;  %v492_v31 = vsub.f32 1.5, %v491_v6  ;;  %v893_v21 = vpop.eup %892  ;;  %v1456_v18 = vadd.f32 1e-05, %v432_v12  ;;  %vm505_vm11 = vweird.f32 %v891_v56 }
 0x1b6   :  { %v500_v52 = vmul.f32 %v891_v56, %v499_v47  ;;  %v579_v11 = vmul.f32 %v893_v21, %v1434_v19  ;;  %746 = vst [vmem:[#allocation2 + $0xa0] sm:$0xff] %v714_v37  ;;  %vm585_vm12 = vweird.f32 %v893_v21  ;;  %vm506_vm13 = vmor %vm504_vm9, %vm505_vm11  ;;  %vm514_vm0 = vweird.f32 %v1444_v9 }
 0x1b7   :  { %v577_v35 = vsel %vm576_vm8, %v887_v30, %v573_v63  ;;  %v493_v0 = vmul.f32 %v889_v48, %v492_v31  ;;  %v422_v13 = vpop.xlane.xlu0 %421  ;;  %896 = vrsqrt.f32 %v1456_v18  ;;  %747 = vst [vmem:[#allocation2 + $0xa8] sm:$0xff] %v715_v50  ;;  %vm586_vm15 = vmor %vm584_vm14, %vm585_vm12  ;;  %vm524_vm4 = vweird.f32 %v1456_v18 }
 0x1b8   :  { %v640_v44 = vmul.f32 %v577_v35, %v1247_v14  ;;  %v641_v17 = vmul.f32 %v577_v35, %v1250_v55  ;;  %v501_v62 = vmul.f32 0.5, %v500_v52  ;;  %v580_v57 = vmul.f32 %v893_v21, %v579_v11 }
 0x1b9   :  { %v497_v30 = vsel %vm496_vm10, %v889_v48, %v493_v0  ;;  %v440_v23 = vmul.f32 %v422_v13, %v1177_v5  ;;  %v401_v25 = vpop.xlane.xlu2 %400 }
 0x1ba   :  { %v678_v36 = vmul.f32 %v1370_v54, %v640_v44  ;;  %v679_v14 = vmul.f32 %v1372_v58, %v641_v17  ;;  %v624_v55 = vmul.f32 %v497_v30, %v1254_v15  ;;  %v625_v40 = vmul.f32 %v497_v30, %v1257_v16  ;;  %v1471_v20 = vpop.eup %894 }
 0x1bb   :  { %v502_v41 = vsub.f32 1.5, %v501_v62  ;;  %v581_v8 = vmul.f32 0.5, %v580_v57  ;;  %v1473_v46 = vadd.f32 1e-05, %v440_v23  ;;  %v433_v48 = vmul.f32 %v401_v25, %v1177_v5 }
 0x1bc   :  { %v716_v22 = vadd.f32 %v1376_v59, %v678_v36  ;;  %v717_v1 = vadd.f32 %v1378_v49, %v679_v14  ;;  %v662_v53 = vmul.f32 %v1370_v54, %v624_v55  ;;  %v663_v10 = vmul.f32 %v1372_v58, %v625_v40 }
 0x1bd   :  { %v503_v26 = vmul.f32 %v891_v56, %v502_v41  ;;  %v582_v15 = vsub.f32 1.5, %v581_v8  ;;  %v509_v16 = vmul.f32 %v1471_v20, %v1444_v9  ;;  %v897_v6 = vpop.eup %896  ;;  %898 = vrsqrt.f32 %v1473_v46 }
 0x1be   :  { %748 = vst [vmem:[#allocation2 + $0xb0] sm:$0xff] %v716_v22  ;;  %v700_v12 = vadd.f32 %v1376_v59, %v662_v53  ;;  %v701_v61 = vadd.f32 %v1378_v49, %v663_v10  ;;  %v519_v31 = vmul.f32 %v897_v6, %v1456_v18  ;;  %v1495_v3 = vadd.f32 1e-05, %v433_v48 }
 0x1bf   :  { %749 = vst [vmem:[#allocation2 + $0xb8] sm:$0xff] %v717_v1  ;;  %v507_v28 = vsel %vm506_vm13, %v891_v56, %v503_v26  ;;  %v583_v47 = vmul.f32 %v893_v21, %v582_v15  ;;  %v510_v63 = vmul.f32 %v1471_v20, %v509_v16  ;;  %v425_v37 = vpop.xlane.xlu1 %424  ;;  %vm515_vm1 = vweird.f32 %v1471_v20 }
 0x1c0   :  { %732 = vst [vmem:[#allocation2 + $0x30] sm:$0xff] %v700_v12  ;;  %v626_v50 = vmul.f32 %v507_v28, %v1270_v33  ;;  %v627_v52 = vmul.f32 %v507_v28, %v1273_v34  ;;  %v520_v35 = vmul.f32 %v897_v6, %v519_v31  ;;  %v441_v0 = vmul.f32 %v425_v37, %v1177_v5  ;;  %vm516_vm3 = vmor %vm514_vm0, %vm515_vm1 }
 0x1c1   :  { %733 = vst [vmem:[#allocation2 + $0x38] sm:$0xff] %v701_v61  ;;  %v587_v19 = vsel %vm586_vm15, %v893_v21, %v583_v47  ;;  %v511_v56 = vmul.f32 0.5, %v510_v63  ;;  %900 = vrsqrt.f32 %v1495_v3  ;;  %v419_v62 = vpop.xlane.xlu2 %418  ;;  %vm525_vm2 = vweird.f32 %v897_v6 }
 0x1c2   :  { %v664_v11 = vmul.f32 %v1370_v54, %v626_v50  ;;  %v665_v13 = vmul.f32 %v1372_v58, %v627_v52  ;;  %v642_v33 = vmul.f32 %v587_v19, %v1276_v39  ;;  %v643_v34 = vmul.f32 %v587_v19, %v1279_v38  ;;  %vm526_vm5 = vmor %vm524_vm4, %vm525_vm2 }
 0x1c3   :  { %v512_v44 = vsub.f32 1.5, %v511_v56  ;;  %v521_v17 = vmul.f32 0.5, %v520_v35  ;;  %v899_v21 = vpop.eup %898  ;;  %v1516_v40 = vadd.f32 1e-05, %v441_v0  ;;  %v439_v41 = vmul.f32 %v419_v62, %v1177_v5 }
 0x1c4   :  { %v702_v30 = vadd.f32 %v1376_v59, %v664_v11  ;;  %v703_v57 = vadd.f32 %v1378_v49, %v665_v13  ;;  %v680_v23 = vmul.f32 %v1370_v54, %v642_v33  ;;  %v681_v25 = vmul.f32 %v1372_v58, %v643_v34 }
 0x1c5   :  { %v513_v39 = vmul.f32 %v1471_v20, %v512_v44  ;;  %v522_v36 = vsub.f32 1.5, %v521_v17  ;;  %v599_v38 = vmul.f32 %v899_v21, %v1473_v46  ;;  %902 = vrsqrt.f32 %v1516_v40 }
 0x1c6   :  { %734 = vst [vmem:[#allocation2 + $0x40] sm:$0xff] %v702_v30  ;;  %v718_v14 = vadd.f32 %v1376_v59, %v680_v23  ;;  %v719_v55 = vadd.f32 %v1378_v49, %v681_v25  ;;  %v1525_v26 = vadd.f32 1e-05, %v439_v41  ;;  %vm605_vm6 = vweird.f32 %v899_v21 }
 0x1c7   :  { %735 = vst [vmem:[#allocation2 + $0x48] sm:$0xff] %v703_v57  ;;  %v517_v8 = vsel %vm516_vm3, %v1471_v20, %v513_v39  ;;  %v523_v48 = vmul.f32 %v897_v6, %v522_v36  ;;  %v600_v22 = vmul.f32 %v899_v21, %v599_v38  ;;  %v901_v9 = vpop.eup %900  ;;  %vm604_vm7 = vweird.f32 %v1473_v46 }
 0x1c8   :  { %750 = vst [vmem:[#allocation2 + $0xc0] sm:$0xff] %v718_v14  ;;  %v628_v1 = vmul.f32 %v517_v8, %v1291_v51  ;;  %v629_v53 = vmul.f32 %v517_v8, %v1294_v60  ;;  %v529_v60 = vmul.f32 %v901_v9, %v1495_v3  ;;  %904 = vrsqrt.f32 %v1525_v26  ;;  %vm606_vm8 = vmor %vm604_vm7, %vm605_vm6 }
 0x1c9   :  { %751 = vst [vmem:[#allocation2 + $0xc8] sm:$0xff] %v719_v55  ;;  %v527_v10 = vsel %vm526_vm5, %v897_v6, %v523_v48  ;;  %v601_v5 = vmul.f32 0.5, %v600_v22  ;;  %vm535_vm9 = vweird.f32 %v901_v9  ;;  %vm534_vm10 = vweird.f32 %v1495_v3 }
 0x1ca   :  { %v666_v20 = vmul.f32 %v1370_v54, %v628_v1  ;;  %v667_v18 = vmul.f32 %v1372_v58, %v629_v53  ;;  %v630_v15 = vmul.f32 %v527_v10, %v1302_v4  ;;  %v631_v51 = vmul.f32 %v527_v10, %v1305_v27  ;;  %vm536_vm11 = vmor %vm534_vm10, %vm535_vm9 }
 0x1cb   :  { %v602_v16 = vsub.f32 1.5, %v601_v5  ;;  %v530_v4 = vmul.f32 %v901_v9, %v529_v60  ;;  %v903_v63 = vpop.eup %902  ;;  %vm614_vm13 = vweird.f32 %v1516_v40  ;;  %vm594_vm0 = vweird.f32 %v1525_v26 }
 0x1cc   :  { %v704_v12 = vadd.f32 %v1376_v59, %v666_v20  ;;  %v705_v6 = vadd.f32 %v1378_v49, %v667_v18  ;;  %v668_v61 = vmul.f32 %v1370_v54, %v630_v15  ;;  %v669_v28 = vmul.f32 %v1372_v58, %v631_v51 }
 0x1cd   :  { %v603_v47 = vmul.f32 %v899_v21, %v602_v16  ;;  %v531_v50 = vmul.f32 0.5, %v530_v4  ;;  %v609_v52 = vmul.f32 %v903_v63, %v1516_v40  ;;  %vm615_vm12 = vweird.f32 %v903_v63 }
 0x1ce   :  { %736 = vst [vmem:[#allocation2 + $0x50] sm:$0xff] %v704_v12  ;;  %v706_v27 = vadd.f32 %v1376_v59, %v668_v61  ;;  %v707_v31 = vadd.f32 %v1378_v49, %v669_v28  ;;  %v905_v35 = vpop.eup %904  ;;  %vm616_vm14 = vmor %vm614_vm13, %vm615_vm12 }
 0x1cf   :  { %737 = vst [vmem:[#allocation2 + $0x58] sm:$0xff] %v705_v6  ;;  %v607_v37 = vsel %vm606_vm8, %v899_v21, %v603_v47  ;;  %v532_v46 = vsub.f32 1.5, %v531_v50  ;;  %v610_v0 = vmul.f32 %v903_v63, %v609_v52  ;;  %v589_v33 = vmul.f32 %v905_v35, %v1525_v26 }
 0x1d0   :  { %738 = vst [vmem:[#allocation2 + $0x60] sm:$0xff] %v706_v27  ;;  %v646_v19 = vmul.f32 %v607_v37, %v1313_v32  ;;  %v647_v56 = vmul.f32 %v607_v37, %v1316_v24  ;;  %vm595_vm15 = vweird.f32 %v905_v35 }
 0x1d1   :  { %739 = vst [vmem:[#allocation2 + $0x68] sm:$0xff] %v707_v31  ;;  %v533_v34 = vmul.f32 %v901_v9, %v532_v46  ;;  %v611_v44 = vmul.f32 0.5, %v610_v0  ;;  %v590_v24 = vmul.f32 %v905_v35, %v589_v33  ;;  %vm596_vm1 = vmor %vm594_vm0, %vm595_vm15 }
 0x1d2   :  { %v684_v11 = vmul.f32 %v1370_v54, %v646_v19  ;;  %v685_v13 = vmul.f32 %v1372_v58, %v647_v56 }
 0x1d3   :  { %v537_v62 = vsel %vm536_vm11, %v901_v9, %v533_v34  ;;  %v612_v21 = vsub.f32 1.5, %v611_v44  ;;  %v591_v23 = vmul.f32 0.5, %v590_v24 }
 0x1d4   :  { %v722_v17 = vadd.f32 %v1376_v59, %v684_v11  ;;  %v723_v32 = vadd.f32 %v1378_v49, %v685_v13  ;;  %v632_v30 = vmul.f32 %v537_v62, %v1321_v2  ;;  %v633_v57 = vmul.f32 %v537_v62, %v1324_v29 }
 0x1d5   :  { %v613_v25 = vmul.f32 %v903_v63, %v612_v21  ;;  %v592_v36 = vsub.f32 1.5, %v591_v23 }
 0x1d6   :  { %754 = vst [vmem:[#allocation2 + $0xe0] sm:$0xff] %v722_v17  ;;  %v670_v3 = vmul.f32 %v1370_v54, %v632_v30  ;;  %v671_v39 = vmul.f32 %v1372_v58, %v633_v57 }
 0x1d7   :  { %755 = vst [vmem:[#allocation2 + $0xe8] sm:$0xff] %v723_v32  ;;  %v617_v38 = vsel %vm616_vm14, %v903_v63, %v613_v25  ;;  %v593_v41 = vmul.f32 %v905_v35, %v592_v36 }
 0x1d8   :  { %v708_v14 = vadd.f32 %v1376_v59, %v670_v3  ;;  %v709_v55 = vadd.f32 %v1378_v49, %v671_v39  ;;  %v648_v2 = vmul.f32 %v617_v38, %v1342_v42  ;;  %v649_v29 = vmul.f32 %v617_v38, %v1345_v7 }
 0x1d9   :  { %v597_v48 = vsel %vm596_vm1, %v905_v35, %v593_v41 }
 0x1da   :  { %740 = vst [vmem:[#allocation2 + $0x70] sm:$0xff] %v708_v14  ;;  %v686_v40 = vmul.f32 %v1370_v54, %v648_v2  ;;  %v687_v8 = vmul.f32 %v1372_v58, %v649_v29  ;;  %v644_v53 = vmul.f32 %v597_v48, %v1335_v43  ;;  %v645_v42 = vmul.f32 %v597_v48, %v1338_v45 }
 0x1db   :  { %741 = vst [vmem:[#allocation2 + $0x78] sm:$0xff] %v709_v55 }
 0x1dc   :  { %v724_v22 = vadd.f32 %v1376_v59, %v686_v40  ;;  %v725_v1 = vadd.f32 %v1378_v49, %v687_v8  ;;  %v682_v7 = vmul.f32 %v1370_v54, %v644_v53  ;;  %v683_v9 = vmul.f32 %v1372_v58, %v645_v42 }
 0x1de   :  { %756 = vst [vmem:[#allocation2 + $0xf0] sm:$0xff] %v724_v22  ;;  %v720_v10 = vadd.f32 %v1376_v59, %v682_v7  ;;  %v721_v5 = vadd.f32 %v1378_v49, %v683_v9 }
 0x1df   :  { %757 = vst [vmem:[#allocation2 + $0xf8] sm:$0xff] %v725_v1 }
 0x1e0   :  { %752 = vst [vmem:[#allocation2 + $0xd0] sm:$0xff] %v720_v10 }
 0x1e1   :  { %753 = vst [vmem:[#allocation2 + $0xd8] sm:$0xff] %v721_v5 }
 0x1e2   :  { %770 = dma.vmem_to_hbm [thread:$0]  %s763_s4, 4096, %s765_s13, [#allocation3], %s934_s14, %s934_s14, %s935_s15  }
 0x1e3   :  { %930 = dma.done.wait [#allocation3], 4096  }
 0x1e4   :  { %931 = vsyncadd [#allocation3], 4294963200 }
 0x1e5   :  { %775 = vsyncpa [#allocation3], 1 }

</bundles_post_ra>
